<compile_context>
chip_gen: v7x
topology: tpu7x:2x2x1
jax: 0.10.0
libtpu: 0.0.40
codegen_flags: <defaults>
</compile_context>

<pallas_src>
import functools

import jax
import jax.numpy as jnp
from jax.experimental import pallas as pl
from jax.experimental.pallas import tpu as pltpu

_LANE = 128
_SUBLANE = 8


def _round_up(x, m):
    return ((x + m - 1) // m) * m


def gnnstack2_kernel(x_ref, w1_ref, b1_ref, w2_ref, b2_ref,
                     w3_ref, b3_ref, w4_ref, b4_ref, o_ref):
    # fc1 on all three streams at once via the block-diagonal weight.
    h = jnp.dot(x_ref[...], w1_ref[...], preferred_element_type=jnp.float32)
    h = jnp.maximum(h + b1_ref[...], 0.0)                       # (tm, 192)
    # fc2
    h = jnp.dot(h, w2_ref[...], preferred_element_type=jnp.float32)
    h = jnp.maximum(h + b2_ref[...], 0.0)                       # (tm, input_dim)
    # fc3
    h = jnp.dot(h, w3_ref[...], preferred_element_type=jnp.float32)
    h = jnp.maximum(h + b3_ref[...], 0.0)                       # (tm, 64)
    # fc4 (output lanes padded to a multiple of 128 -> unmasked full-lane store)
    o_ref[...] = (jnp.dot(h, w4_ref[...], preferred_element_type=jnp.float32)
                  + b4_ref[...])


@functools.partial(jax.jit, static_argnames=("tm",))
def gnnstack2_forward(x_pdt, x_ref, x_def, params, *, tm=512):
    """GNNStack2 forward with a row-tiled, lane-dense Pallas kernel.

    x_pdt / x_ref / x_def: (N, input_dim) float32 (any N).
    params: PyTorch-layout weights w1..w4 (out, in) and biases b1..b4 (1, out).
    """
    assert tm % _SUBLANE == 0, "tm must be a multiple of 8"
    N, input_dim = x_pdt.shape
    w1, b1 = params["w1"], params["b1"]   # (64, in),        (1, 64)
    w2, b2 = params["w2"], params["b2"]   # (in, 192),       (1, in)
    w3, b3 = params["w3"], params["b3"]   # (64, in),        (1, 64)
    w4, b4 = params["w4"], params["b4"]   # (out, 64),       (1, out)
    output_dim = w4.shape[0]

    # ---------------- host-side weight preparation (once, under jit) --------
    # fc1 applied to three streams == block-diagonal (3*in_dim, 192) matmul on
    # the lane-concatenated input.  Pad the contraction dim to 128 lanes; the
    # padded rows are zero, so the result is exact.
    in3 = 3 * input_dim
    k_pad = _round_up(in3, _LANE)
    w1_t = w1.T                                                  # (in, 64)
    w1_bd = jnp.zeros((k_pad, 3 * 64), jnp.float32)
    for j in range(3):
        w1_bd = w1_bd.at[j * input_dim:(j + 1) * input_dim,
                         j * 64:(j + 1) * 64].set(w1_t)
    b1_cat = jnp.tile(b1, (1, 3))                                # (1, 192)

    w2_t = w2.T                                                  # (192, in)
    w3_t = w3.T                                                  # (in, 64)

    # Lane-dense output: pad fc4 to 128 output lanes (zero columns).
    out_pad = _round_up(output_dim, _LANE)
    w4_t = jnp.zeros((64, out_pad), jnp.float32).at[:, :output_dim].set(w4.T)
    b4_p = jnp.zeros((1, out_pad), jnp.float32).at[:, :output_dim].set(b4)

    # ---------------- input preparation -------------------------------------
    x_cat = jnp.concatenate([x_pdt, x_ref, x_def], axis=1)       # (N, 3*in)
    tm_eff = max(_SUBLANE, min(tm, _round_up(N, _SUBLANE)))      # multiple of 8
    n_pad = _round_up(N, tm_eff)
    x_cat = jnp.pad(x_cat, ((0, n_pad - N), (0, k_pad - in3)))

    grid = (n_pad // tm_eff,)

    row_in = pl.BlockSpec((tm_eff, k_pad), lambda i: (i, 0))
    row_out = pl.BlockSpec((tm_eff, out_pad), lambda i: (i, 0))

    def full(a):
        # Whole array as a single resident block (constant index map -> no
        # re-DMA across grid steps).
        return pl.BlockSpec(a.shape, lambda i: (0, 0))

    out_padded = pl.pallas_call(
        gnnstack2_kernel,
        out_shape=jax.ShapeDtypeStruct((n_pad, out_pad), jnp.float32),
        grid_spec=pltpu.PrefetchScalarGridSpec(
            num_scalar_prefetch=0,
            grid=grid,
            in_specs=[
                row_in,                                # concatenated inputs
                full(w1_bd), full(b1_cat),             # fc1 (block-diag)
                full(w2_t), full(b2),                  # fc2
                full(w3_t), full(b3),                  # fc3
                full(w4_t), full(b4_p),                # fc4 (lane-padded)
            ],
            out_specs=row_out,
        ),
        compiler_params=pltpu.CompilerParams(
            dimension_semantics=("parallel",)),
    )(x_cat, w1_bd, b1_cat, w2_t, b2, w3_t, b3, w4_t, b4_p)

    return out_padded[:N, :output_dim]


def init_params(key, input_dim, output_dim):
    """Deterministic init mimicking nn.Linear (uniform +/- 1/sqrt(fan_in))."""
    def linear_init(k, out_f, in_f):
        kw, kb = jax.random.split(k)
        bound = 1.0 / jnp.sqrt(jnp.float32(in_f))
        w = jax.random.uniform(kw, (out_f, in_f), jnp.float32, -bound, bound)
        b = jax.random.uniform(kb, (1, out_f), jnp.float32, -bound, bound)
        return w, b

    k1, k2, k3, k4 = jax.random.split(key, 4)
    w1, b1 = linear_init(k1, 64, input_dim)        # fc1: input_dim -> 64
    w2, b2 = linear_init(k2, input_dim, 64 * 3)    # fc2: 192 -> input_dim
    w3, b3 = linear_init(k3, 64, input_dim)        # fc3: input_dim -> 64
    w4, b4 = linear_init(k4, output_dim, 64)       # fc4: 64 -> output_dim
    return dict(w1=w1, b1=b1, w2=w2, b2=b2, w3=w3, b3=b3, w4=w4, b4=b4)


def reference_forward(x_pdt, x_ref, x_def, p):
    def lin(x, w, b):
        return x @ w.T + b
    hp = jax.nn.relu(lin(x_pdt, p["w1"], p["b1"]))
    hr = jax.nn.relu(lin(x_ref, p["w1"], p["b1"]))
    hd = jax.nn.relu(lin(x_def, p["w1"], p["b1"]))
    h = jnp.concatenate([hp, hr, hd], axis=1)
    h = jax.nn.relu(lin(h, p["w2"], p["b2"]))
    h = jax.nn.relu(lin(h, p["w3"], p["b3"]))
    return lin(h, p["w4"], p["b4"])


if __name__ == "__main__":
    input_dim = 16
    output_dim = 8
    N = 300  # not a multiple of the tile or of 128: exercises row padding

    key = jax.random.PRNGKey(0)
    kx1, kx2, kx3, kp = jax.random.split(key, 4)
    x_pdt = jax.random.normal(kx1, (N, input_dim), jnp.float32)
    x_ref = jax.random.normal(kx2, (N, input_dim), jnp.float32)
    x_def = jax.random.normal(kx3, (N, input_dim), jnp.float32)

    params = init_params(kp, input_dim, output_dim)

    # Small N -> small tile (keeps a few grid steps alive); at large N the
    # default tm=512 amortizes the ~0.35 us per-step overhead.
    out = gnnstack2_forward(x_pdt, x_ref, x_def, params, tm=128)
    out = jax.block_until_ready(out)

    ref = reference_forward(x_pdt, x_ref, x_def, params)
    assert out.shape == (N, output_dim), out.shape
    assert jnp.allclose(out, ref, atol=1e-4, rtol=1e-4), "Pallas != reference"

    print("KERNEL_OK")
</pallas_src>

<mosaic_0001>
module attributes {stable_mosaic.version = 11 : i64} {
  func.func @gnnstack2_kernel(%arg0: i32, %arg1: memref<128x128xf32, #tpu.memory_space<vmem>>, %arg2: memref<128x192xf32, #tpu.memory_space<vmem>>, %arg3: memref<1x192xf32, #tpu.memory_space<vmem>>, %arg4: memref<192x16xf32, #tpu.memory_space<vmem>>, %arg5: memref<1x16xf32, #tpu.memory_space<vmem>>, %arg6: memref<16x64xf32, #tpu.memory_space<vmem>>, %arg7: memref<1x64xf32, #tpu.memory_space<vmem>>, %arg8: memref<64x128xf32, #tpu.memory_space<vmem>>, %arg9: memref<1x128xf32, #tpu.memory_space<vmem>>, %arg10: memref<128x128xf32, #tpu.memory_space<vmem>>) attributes {dimension_semantics = [#tpu.dimension_semantics<parallel>], iteration_bounds = array<i64: 3>, scalar_prefetch = 0 : i64, scratch_operands = 0 : i64, tpu.core_type = #tpu.core_type<tc>, window_params = [{transform_indices = @transform_0, window_bounds = array<i64: 128, 128>}, {pipeline_mode = #tpu.pipeline_mode<synchronous>, transform_indices = @transform_1, window_bounds = array<i64: 128, 192>}, {pipeline_mode = #tpu.pipeline_mode<synchronous>, transform_indices = @transform_2, window_bounds = array<i64: 1, 192>}, {pipeline_mode = #tpu.pipeline_mode<synchronous>, transform_indices = @transform_3, window_bounds = array<i64: 192, 16>}, {pipeline_mode = #tpu.pipeline_mode<synchronous>, transform_indices = @transform_4, window_bounds = array<i64: 1, 16>}, {pipeline_mode = #tpu.pipeline_mode<synchronous>, transform_indices = @transform_5, window_bounds = array<i64: 16, 64>}, {pipeline_mode = #tpu.pipeline_mode<synchronous>, transform_indices = @transform_6, window_bounds = array<i64: 1, 64>}, {pipeline_mode = #tpu.pipeline_mode<synchronous>, transform_indices = @transform_7, window_bounds = array<i64: 64, 128>}, {pipeline_mode = #tpu.pipeline_mode<synchronous>, transform_indices = @transform_8, window_bounds = array<i64: 1, 128>}, {transform_indices = @transform_9, window_bounds = array<i64: 128, 128>}]} {
    %c0 = arith.constant 0 : index
    %c0_0 = arith.constant 0 : index
    %0 = vector.load %arg1[%c0, %c0_0] : memref<128x128xf32, #tpu.memory_space<vmem>>, vector<128x128xf32>
    %c0_1 = arith.constant 0 : index
    %c0_2 = arith.constant 0 : index
    %1 = vector.load %arg2[%c0_1, %c0_2] : memref<128x192xf32, #tpu.memory_space<vmem>>, vector<128x192xf32>
    %cst = arith.constant dense<0.000000e+00> : vector<128x192xf32>
    %2 = tpu.matmul %0, %1, %cst {dimension_numbers = #tpu.dot_dimension_numbers<[1], [0], [0], [1], [0, 0, 1, 1], [], []>} : vector<128x128xf32>, vector<128x192xf32>, vector<128x192xf32> -> vector<128x192xf32>
    %c0_3 = arith.constant 0 : index
    %c0_4 = arith.constant 0 : index
    %3 = vector.load %arg3[%c0_3, %c0_4] : memref<1x192xf32, #tpu.memory_space<vmem>>, vector<1x192xf32>
    %4 = vector.broadcast %3 : vector<1x192xf32> to vector<128x192xf32>
    %5 = arith.addf %2, %4 : vector<128x192xf32>
    %cst_5 = arith.constant 0.000000e+00 : f32
    %6 = vector.broadcast %cst_5 : f32 to vector<128x192xf32>
    %7 = arith.maximumf %5, %6 : vector<128x192xf32>
    %c0_6 = arith.constant 0 : index
    %c0_7 = arith.constant 0 : index
    %8 = vector.load %arg4[%c0_6, %c0_7] : memref<192x16xf32, #tpu.memory_space<vmem>>, vector<192x16xf32>
    %cst_8 = arith.constant dense<0.000000e+00> : vector<128x16xf32>
    %9 = tpu.matmul %7, %8, %cst_8 {dimension_numbers = #tpu.dot_dimension_numbers<[1], [0], [0], [1], [0, 0, 1, 1], [], []>} : vector<128x192xf32>, vector<192x16xf32>, vector<128x16xf32> -> vector<128x16xf32>
    %c0_9 = arith.constant 0 : index
    %c0_10 = arith.constant 0 : index
    %10 = vector.load %arg5[%c0_9, %c0_10] : memref<1x16xf32, #tpu.memory_space<vmem>>, vector<1x16xf32>
    %11 = vector.broadcast %10 : vector<1x16xf32> to vector<128x16xf32>
    %12 = arith.addf %9, %11 : vector<128x16xf32>
    %cst_11 = arith.constant 0.000000e+00 : f32
    %13 = vector.broadcast %cst_11 : f32 to vector<128x16xf32>
    %14 = arith.maximumf %12, %13 : vector<128x16xf32>
    %c0_12 = arith.constant 0 : index
    %c0_13 = arith.constant 0 : index
    %15 = vector.load %arg6[%c0_12, %c0_13] : memref<16x64xf32, #tpu.memory_space<vmem>>, vector<16x64xf32>
    %cst_14 = arith.constant dense<0.000000e+00> : vector<128x64xf32>
    %16 = tpu.matmul %14, %15, %cst_14 {dimension_numbers = #tpu.dot_dimension_numbers<[1], [0], [0], [1], [0, 0, 1, 1], [], []>} : vector<128x16xf32>, vector<16x64xf32>, vector<128x64xf32> -> vector<128x64xf32>
    %c0_15 = arith.constant 0 : index
    %c0_16 = arith.constant 0 : index
    %17 = vector.load %arg7[%c0_15, %c0_16] : memref<1x64xf32, #tpu.memory_space<vmem>>, vector<1x64xf32>
    %18 = vector.broadcast %17 : vector<1x64xf32> to vector<128x64xf32>
    %19 = arith.addf %16, %18 : vector<128x64xf32>
    %cst_17 = arith.constant 0.000000e+00 : f32
    %20 = vector.broadcast %cst_17 : f32 to vector<128x64xf32>
    %21 = arith.maximumf %19, %20 : vector<128x64xf32>
    %c0_18 = arith.constant 0 : index
    %c0_19 = arith.constant 0 : index
    %22 = vector.load %arg8[%c0_18, %c0_19] : memref<64x128xf32, #tpu.memory_space<vmem>>, vector<64x128xf32>
    %cst_20 = arith.constant dense<0.000000e+00> : vector<128x128xf32>
    %23 = tpu.matmul %21, %22, %cst_20 {dimension_numbers = #tpu.dot_dimension_numbers<[1], [0], [0], [1], [0, 0, 1, 1], [], []>} : vector<128x64xf32>, vector<64x128xf32>, vector<128x128xf32> -> vector<128x128xf32>
    %c0_21 = arith.constant 0 : index
    %c0_22 = arith.constant 0 : index
    %24 = vector.load %arg9[%c0_21, %c0_22] : memref<1x128xf32, #tpu.memory_space<vmem>>, vector<1x128xf32>
    %25 = vector.broadcast %24 : vector<1x128xf32> to vector<128x128xf32>
    %26 = arith.addf %23, %25 : vector<128x128xf32>
    %c0_23 = arith.constant 0 : index
    %c0_24 = arith.constant 0 : index
    %27 = vector.load %arg10[%c0_23, %c0_24] : memref<128x128xf32, #tpu.memory_space<vmem>>, vector<128x128xf32>
    tpu.vector_store %arg10[%c0_23, %c0_24], %26 {strides = array<i32>} : memref<128x128xf32, #tpu.memory_space<vmem>>, vector<128x128xf32>,
    return
  }
  func.func @transform_0(%arg0: i32) -> (i32, i32) {
    %c0_i32 = arith.constant 0 : i32
    %c0_i32_0 = arith.constant 0 : i32
    return %arg0, %c0_i32 : i32, i32
  }
  func.func @transform_1(%arg0: i32) -> (i32, i32) {
    %c0_i32 = arith.constant 0 : i32
    %c0_i32_0 = arith.constant 0 : i32
    %c0_i32_1 = arith.constant 0 : i32
    return %c0_i32, %c0_i32_0 : i32, i32
  }
  func.func @transform_2(%arg0: i32) -> (i32, i32) {
    %c0_i32 = arith.constant 0 : i32
    %c0_i32_0 = arith.constant 0 : i32
    %c0_i32_1 = arith.constant 0 : i32
    return %c0_i32, %c0_i32_0 : i32, i32
  }
  func.func @transform_3(%arg0: i32) -> (i32, i32) {
    %c0_i32 = arith.constant 0 : i32
    %c0_i32_0 = arith.constant 0 : i32
    %c0_i32_1 = arith.constant 0 : i32
    return %c0_i32, %c0_i32_0 : i32, i32
  }
  func.func @transform_4(%arg0: i32) -> (i32, i32) {
    %c0_i32 = arith.constant 0 : i32
    %c0_i32_0 = arith.constant 0 : i32
    %c0_i32_1 = arith.constant 0 : i32
    return %c0_i32, %c0_i32_0 : i32, i32
  }
  func.func @transform_5(%arg0: i32) -> (i32, i32) {
    %c0_i32 = arith.constant 0 : i32
    %c0_i32_0 = arith.constant 0 : i32
    %c0_i32_1 = arith.constant 0 : i32
    return %c0_i32, %c0_i32_0 : i32, i32
  }
  func.func @transform_6(%arg0: i32) -> (i32, i32) {
    %c0_i32 = arith.constant 0 : i32
    %c0_i32_0 = arith.constant 0 : i32
    %c0_i32_1 = arith.constant 0 : i32
    return %c0_i32, %c0_i32_0 : i32, i32
  }
  func.func @transform_7(%arg0: i32) -> (i32, i32) {
    %c0_i32 = arith.constant 0 : i32
    %c0_i32_0 = arith.constant 0 : i32
    %c0_i32_1 = arith.constant 0 : i32
    return %c0_i32, %c0_i32_0 : i32, i32
  }
  func.func @transform_8(%arg0: i32) -> (i32, i32) {
    %c0_i32 = arith.constant 0 : i32
    %c0_i32_0 = arith.constant 0 : i32
    %c0_i32_1 = arith.constant 0 : i32
    return %c0_i32, %c0_i32_0 : i32, i32
  }
  func.func @transform_9(%arg0: i32) -> (i32, i32) {
    %c0_i32 = arith.constant 0 : i32
    %c0_i32_0 = arith.constant 0 : i32
    return %arg0, %c0_i32 : i32, i32
  }
}

</mosaic_0001>

<bundles_post_ra>
// kernel: gnnstack2_forward.1
= control target key start
LH: loop header
LB: loop body
LE: loop exit
PB: predicated region body
PF: predicated region fallthrough
CT: control target
= control target key end

     0   :  { %s1683_s30 = smov 0   ;;  %s2098_s0 = inlined_call_operand.vmem [shape: f32[384,128], index: 0, kind: input, shape index: {}]   ;;  %s2099_s1 = inlined_call_operand.vmem [shape: f32[128,192], index: 1, kind: input, shape index: {}]   ;;  %s2100_s2 = inlined_call_operand.vmem [shape: f32[1,192], index: 2, kind: input, shape index: {}]   ;;  %s2101_s3 = inlined_call_operand.vmem [shape: f32[192,16], index: 3, kind: input, shape index: {}]   ;;  %s2102_s4 = inlined_call_operand.vmem [shape: f32[1,16], index: 4, kind: input, shape index: {}]   ;;  %s2103_s5 = inlined_call_operand.vmem [shape: f32[16,64], index: 5, kind: input, shape index: {}]   ;;  %s2104_s6 = inlined_call_operand.vmem [shape: f32[1,64], index: 6, kind: input, shape index: {}]   ;;  %s2105_s7 = inlined_call_operand.vmem [shape: f32[64,128], index: 7, kind: input, shape index: {}]   ;;  %s2106_s8 = inlined_call_operand.vmem [shape: f32[1,128], index: 8, kind: input, shape index: {}]   ;;  %s2107_s9 = inlined_call_operand.vmem [shape: f32[384,128], index: 9, kind: output, shape index: {}]  }
   0x1 LB: > { %s1329_s10 = sadd.s32 4294967295, %s1629_s30   ;;  %p1333_p0 = scmp.ge.s32.totalorder %s1629_s30, 1  ;;  %s1629_s30 = sphi %s1683_s30, %s19_s30  }
   0x2   : > { %p288_p1 = scmp.lt.s32.totalorder %s1629_s30, 4 }
   0x4   : > { %p289_p2 = pnand %p1333_p0, %p288_p1 }
   0x5   : > { %v353_v0 = vld [vmem:[%s2099_s1 + $0x8] sm:$0xff] (!%p289_p2)  ;;  %v355_v1 = vld [vmem:[%s2099_s1 + $0x18] sm:$0xff] (!%p289_p2)  ;;  %v352_v2 = vld [vmem:[%s2099_s1] sm:$0xff] (!%p289_p2)  ;;  %v1631_v7 = vmov (!%p289_p2), 0.0   ;;  %v1632_v8 = vmov (!%p289_p2), 0.0|0.0   ;;  %s1334_s17 = sshll.u32 (!%p289_p2), %s1329_s10, 4 }
   0x6   : > { %292 = sbr.rel (%p289_p2) target bundleno = 968 (0x3c8), region = 56  ;;  %v1501_v3 = vpack.c.bf16 (!%p289_p2), %v355_v1, %v353_v0  ;;  %v354_v4 = vld [vmem:[%s2099_s1 + $0x10] sm:$0xff] (!%p289_p2)  ;;  %v357_v5 = vld [vmem:[%s2099_s1 + $0x28] sm:$0xff] (!%p289_p2)  ;;  %v359_v6 = vld [vmem:[%s2099_s1 + $0x38] sm:$0xff] (!%p289_p2)  ;;  %460 = vmatprep.mubr.f32.mxu0 (!%p289_p2), %v1631_v7  ;;  %1589 = vmatprep.subr.bf16.mxu1 (!%p289_p2), %v1632_v8  ;;  %p325_p3 = scmp.lt.s32.totalorder (!%p289_p2), %s1334_s17, 47  ;;  %vm620_vm0 = vcmask (!%p289_p2), 523264  }
   0x7   : > { %v1503_v9 = vpack.c.bf16 (!%p289_p2), %v354_v4, %v352_v2  ;;  %v1505_v10 = vpack.c.bf16 (!%p289_p2), %v359_v6, %v357_v5  ;;  %v356_v11 = vld [vmem:[%s2099_s1 + $0x20] sm:$0xff] (!%p289_p2)  ;;  %v358_v12 = vld [vmem:[%s2099_s1 + $0x30] sm:$0xff] (!%p289_p2)  ;;  %v361_v13 = vld [vmem:[%s2099_s1 + $0x48] sm:$0xff] (!%p289_p2)  ;;  %vm839_vm1 = vcmask (!%p289_p2), 130048  }
   0x8   : > { %1502 = vmatprep.subr.bf16.mxu0 (!%p289_p2), %v1501_v3  ;;  %v363_v14 = vld [vmem:[%s2099_s1 + $0x58] sm:$0xff] (!%p289_p2)  ;;  %v1507_v15 = vpack.c.bf16 (!%p289_p2), %v358_v12, %v356_v11  ;;  %v360_v17 = vld [vmem:[%s2099_s1 + $0x40] sm:$0xff] (!%p289_p2)  ;;  %v362_v18 = vld [vmem:[%s2099_s1 + $0x50] sm:$0xff] (!%p289_p2) }
   0x9   : > { %1504 = vmatpush1.bf16.msra.mxu0 (!%p289_p2), %v1503_v9  ;;  %v1509_v16 = vpack.c.bf16 (!%p289_p2), %v363_v14, %v361_v13  ;;  %v365_v19 = vld [vmem:[%s2099_s1 + $0x68] sm:$0xff] (!%p289_p2)  ;;  %v367_v20 = vld [vmem:[%s2099_s1 + $0x78] sm:$0xff] (!%p289_p2)  ;;  %v1511_v21 = vpack.c.bf16 (!%p289_p2), %v362_v18, %v360_v17  ;;  %v364_v23 = vld [vmem:[%s2099_s1 + $0x60] sm:$0xff] (!%p289_p2) }
   0xa   : > { %1506 = vmatprep.subr.bf16.mxu0 (!%p289_p2), %v1505_v10  ;;  %v1513_v22 = vpack.c.bf16 (!%p289_p2), %v367_v20, %v365_v19  ;;  %v366_v24 = vld [vmem:[%s2099_s1 + $0x70] sm:$0xff] (!%p289_p2)  ;;  %v369_v25 = vld [vmem:[%s2099_s1 + $0x88] sm:$0xff] (!%p289_p2)  ;;  %v371_v26 = vld [vmem:[%s2099_s1 + $0x98] sm:$0xff] (!%p289_p2) }
   0xb   : > { %v1515_v27 = vpack.c.bf16 (!%p289_p2), %v366_v24, %v364_v23  ;;  %v1517_v28 = vpack.c.bf16 (!%p289_p2), %v371_v26, %v369_v25  ;;  %v368_v29 = vld [vmem:[%s2099_s1 + $0x80] sm:$0xff] (!%p289_p2)  ;;  %v370_v30 = vld [vmem:[%s2099_s1 + $0x90] sm:$0xff] (!%p289_p2)  ;;  %v373_v31 = vld [vmem:[%s2099_s1 + $0xa8] sm:$0xff] (!%p289_p2) }
   0xc   : > { %v375_v32 = vld [vmem:[%s2099_s1 + $0xb8] sm:$0xff] (!%p289_p2)  ;;  %v1519_v33 = vpack.c.bf16 (!%p289_p2), %v370_v30, %v368_v29  ;;  %v589_v34 = vld [vmem:[%s2101_s3] sm:$0xff] (!%p289_p2)  ;;  %v590_v35 = vld [vmem:[%s2101_s3 + $0x8] sm:$0xff] (!%p289_p2) }
   0xd   : > { %1508 = vmatpush1.bf16.msra.mxu0 %v1507_v15  ;;  %v1521_v36 = vpack.c.bf16 %v375_v32, %v373_v31  ;;  %v372_v37 = vld [vmem:[%s2099_s1 + $0xa0] sm:$0xff]  ;;  %v374_v38 = vld [vmem:[%s2099_s1 + $0xb0] sm:$0xff]  ;;  %v377_v39 = vld [vmem:[%s2099_s1 + $0xc8] sm:$0xff]  ;;  %v1534_v40 = vpack.c.bf16 %v590_v35, %v589_v34  ;;  %s2109_s17 = smov (!%p325_p3, %s1334_s17), 47 }
   0xe   : > { %1510 = vmatprep.subr.bf16.mxu0 %v1509_v16  ;;  %v379_v41 = vld [vmem:[%s2099_s1 + $0xd8] sm:$0xff]  ;;  %v591_v42 = vld [vmem:[%s2101_s3 + $0x10] sm:$0xff]  ;;  %v1523_v44 = vpack.c.bf16 %v374_v38, %v372_v37  ;;  %v376_v46 = vld [vmem:[%s2099_s1 + $0xc0] sm:$0xff]  ;;  %s1335_s11 = sshll.u32 %s2109_s17, 3 }
   0xf   : > { %v592_v43 = vld [vmem:[%s2101_s3 + $0x18] sm:$0xff]  ;;  %1601 = vmatpush1.bf16.msra.mxu1 %v1534_v40  ;;  %v1525_v45 = vpack.c.bf16 %v379_v41, %v377_v39  ;;  %v378_v47 = vld [vmem:[%s2099_s1 + $0xd0] sm:$0xff]  ;;  %v381_v48 = vld [vmem:[%s2099_s1 + $0xe8] sm:$0xff]  ;;  %s1827_s19 = scalar_lea.vmem %s2098_s0, %s1335_s11  ;;  %v386_v39 = vlaneseq  ;;  %s2077_s28 = scalar_lea.vmem %s2107_s9, %s1335_s11 }
  0x10   : > { %1590 = vmatprep.subr.bf16.mxu1 %v1632_v8  ;;  %v1537_v49 = vpack.c.bf16 %v592_v43, %v591_v42  ;;  %v383_v50 = vld [vmem:[%s2099_s1 + $0xf8] sm:$0xff]  ;;  %v593_v51 = vld [vmem:[%s2101_s3 + $0x20] sm:$0xff]  ;;  %v594_v52 = vld [vmem:[%s2101_s3 + $0x28] sm:$0xff]  ;;  %v1527_v53 = vpack.c.bf16 %v378_v47, %v376_v46 }
  0x11   : > { %1512 = vmatpush1.bf16.msra.mxu0 %v1511_v21  ;;  %v1529_v54 = vpack.c.bf16 %v383_v50, %v381_v48  ;;  %v380_v55 = vld [vmem:[%s2099_s1 + $0xe0] sm:$0xff]  ;;  %v382_v56 = vld [vmem:[%s2099_s1 + $0xf0] sm:$0xff]  ;;  %v1540_v57 = vpack.c.bf16 %v594_v52, %v593_v51  ;;  %v596_v59 = vld [vmem:[%s2101_s3 + $0x38] sm:$0xff] }
  0x12   : > { %1514 = vmatprep.subr.bf16.mxu0 %v1513_v22  ;;  %v595_v58 = vld [vmem:[%s2101_s3 + $0x30] sm:$0xff]  ;;  %v1531_v60 = vpack.c.bf16 %v382_v56, %v380_v55  ;;  %v597_v62 = vld [vmem:[%s2101_s3 + $0x40] sm:$0xff]  ;;  %v598_v63 = vld [vmem:[%s2101_s3 + $0x48] sm:$0xff] }
  0x13   : > { %1602 = vmatpush1.bf16.msra.mxu1 %v1537_v49  ;;  %v1543_v61 = vpack.c.bf16 %v596_v59, %v595_v58  ;;  %v336_v0 = vld [vmem:[%s1827_s19] sm:$0xff]  ;;  %v1546_v1 = vpack.c.bf16 %v598_v63, %v597_v62  ;;  %v599_v2 = vld [vmem:[%s2101_s3 + $0x50] sm:$0xff]  ;;  %v600_v3 = vld [vmem:[%s2101_s3 + $0x58] sm:$0xff] }
  0x14   : > { %1591 = vmatprep.subr.bf16.mxu1 %v1632_v8  ;;  %v337_v4 = vld [vmem:[%s1827_s19 + $0x8] sm:$0xff]  ;;  %v1549_v5 = vpack.c.bf16 %v600_v3, %v599_v2  ;;  %v601_v6 = vld [vmem:[%s2101_s3 + $0x60] sm:$0xff]  ;;  %v338_v10 = vld [vmem:[%s1827_s19 + $0x10] sm:$0xff] }
  0x15   : > { %1516 = vmatpush1.bf16.msra.mxu0 %v1515_v27  ;;  %v602_v9 = vld [vmem:[%s2101_s3 + $0x68] sm:$0xff]  ;;  %v603_v12 = vld [vmem:[%s2101_s3 + $0x70] sm:$0xff]  ;;  %v604_v13 = vld [vmem:[%s2101_s3 + $0x78] sm:$0xff] }
  0x16   : > { %1518 = vmatprep.subr.bf16.mxu0 %v1517_v28  ;;  %v1552_v11 = vpack.c.bf16 %v602_v9, %v601_v6  ;;  %v339_v14 = vld [vmem:[%s1827_s19 + $0x18] sm:$0xff]  ;;  %v1555_v15 = vpack.c.bf16 %v604_v13, %v603_v12  ;;  %v605_v16 = vld [vmem:[%s2101_s3 + $0x80] sm:$0xff]  ;;  %v606_v17 = vld [vmem:[%s2101_s3 + $0x88] sm:$0xff] }
  0x17   : > { %1603 = vmatpush1.bf16.msra.mxu1 %v1540_v57  ;;  %v340_v18 = vld [vmem:[%s1827_s19 + $0x20] sm:$0xff]  ;;  %v1558_v19 = vpack.c.bf16 %v606_v17, %v605_v16  ;;  %v607_v20 = vld [vmem:[%s2101_s3 + $0x90] sm:$0xff]  ;;  %v608_v21 = vld [vmem:[%s2101_s3 + $0x98] sm:$0xff] }
  0x18   : > { %1592 = vmatprep.subr.bf16.mxu1 %v1632_v8  ;;  %v341_v22 = vld [vmem:[%s1827_s19 + $0x28] sm:$0xff]  ;;  %v1561_v23 = vpack.c.bf16 %v608_v21, %v607_v20  ;;  %v342_v24 = vld [vmem:[%s1827_s19 + $0x30] sm:$0xff]  ;;  %v343_v25 = vld [vmem:[%s1827_s19 + $0x38] sm:$0xff] }
  0x19   : > { %1520 = vmatpush1.bf16.msra.mxu0 %v1519_v33  ;;  %v344_v26 = vld [vmem:[%s1827_s19 + $0x40] sm:$0xff]  ;;  %v345_v27 = vld [vmem:[%s1827_s19 + $0x48] sm:$0xff]  ;;  %v346_v28 = vld [vmem:[%s1827_s19 + $0x50] sm:$0xff] }
  0x1a   : > { %1522 = vmatprep.subr.bf16.mxu0 %v1521_v36  ;;  %v347_v29 = vld [vmem:[%s1827_s19 + $0x58] sm:$0xff]  ;;  %v348_v30 = vld [vmem:[%s1827_s19 + $0x60] sm:$0xff]  ;;  %v349_v31 = vld [vmem:[%s1827_s19 + $0x68] sm:$0xff] }
  0x1b   : > { %1604 = vmatpush1.bf16.msra.mxu1 %v1543_v61  ;;  %v350_v32 = vld [vmem:[%s1827_s19 + $0x70] sm:$0xff]  ;;  %v351_v33 = vld [vmem:[%s1827_s19 + $0x78] sm:$0xff]  ;;  %v609_v34 = vld [vmem:[%s2101_s3 + $0xa0] sm:$0xff] }
  0x1c   : > { %1593 = vmatprep.subr.bf16.mxu1 %v1632_v8  ;;  %v610_v35 = vld [vmem:[%s2101_s3 + $0xa8] sm:$0xff]  ;;  %v611_v37 = vld [vmem:[%s2101_s3 + $0xb0] sm:$0xff]  ;;  %v384_v42 = vld [vmem:[%s2100_s2] sm:$0x3] }
  0x1d   : > { %1524 = vmatpush1.bf16.msra.mxu0 %v1523_v44  ;;  %v1564_v36 = vpack.c.bf16 %v610_v35, %v609_v34 }
  0x1e   : > { %1526 = vmatprep.subr.bf16.mxu0 %v1525_v45 }
  0x1f   : > { %1605 = vmatpush1.bf16.msra.mxu1 %v1546_v1 }
  0x20   : > { %1594 = vmatprep.subr.bf16.mxu1 %v1632_v8 }
  0x21   : > { %1528 = vmatpush1.bf16.msra.mxu0 %v1527_v53 }
  0x22   : > { %1530 = vmatprep.subr.bf16.mxu0 %v1529_v54 }
  0x23   : > { %1606 = vmatpush1.bf16.msra.mxu1 %v1549_v5 }
  0x24   : > { %1595 = vmatprep.subr.bf16.mxu1 %v1632_v8 }
  0x25   : > { %1532 = vmatpush1.bf16.msra.mxu0 %v1531_v60 }
  0x26   : > { %1533 = vmatprep.subr.bf16.mxu0 %v1632_v8 }
  0x27   : > { %1607 = vmatpush1.bf16.msra.mxu1 %v1552_v11 }
  0x28   : > { %461 = vmatmul.mubr.f32.vlgmr.msra.gmra.mrb[0].mxu0 %v336_v0  ;;  %1596 = vmatprep.subr.bf16.mxu1 %v1632_v8 }
  0x29   : > { %466 = vmatprep.mubr.f32.mxu0 %v1631_v7  ;;  %1535 = vmatpush1.bf16.msra.mxu0 %v1534_v40  ;;  %v387_v40 = vshrl.u32 %v386_v39, 7 }
  0x2a   : > { %1536 = vmatprep.subr.bf16.mxu0 %v1632_v8 }
  0x2b   : > { %1608 = vmatpush1.bf16.msra.mxu1 %v1555_v15  ;;  %v388_v41 = vsub.s32 0, %v387_v40  ;;  %v392_v43 = vsub.s32 1, %v387_v40 }
  0x2c   : > { %467 = vmatmul.mubr.f32.gmra.mrb[2].mxu0 %v337_v4  ;;  %1597 = vmatprep.subr.bf16.mxu1 %v1632_v8 }
  0x2d   : > { %472 = vmatprep.mubr.f32.mxu0 %v1631_v7  ;;  %1538 = vmatpush1.bf16.msra.mxu0 %v1537_v49  ;;  %v1931_v44 = vrot.slane %v384_v42, %v388_v41  ;;  %v1933_v45 = vrot.slane %v384_v42, %v392_v43 }
  0x2e   : > { %1539 = vmatprep.subr.bf16.mxu0 %v1632_v8 }
  0x2f   : > { %1609 = vmatpush1.bf16.msra.mxu1 %v1558_v19 }
  0x30   : > { %473 = vmatmul.mubr.f32.gmra.mrb[4].mxu0 %v338_v10  ;;  %1598 = vmatprep.subr.bf16.mxu1 %v1632_v8 }
  0x31   : > { %478 = vmatprep.mubr.f32.mxu0 %v1631_v7  ;;  %1541 = vmatpush1.bf16.msra.mxu0 %v1540_v57 }
  0x32   : > { %1542 = vmatprep.subr.bf16.mxu0 %v1632_v8 }
  0x33   : > { %1610 = vmatpush1.bf16.msra.mxu1 %v1561_v23 }
  0x34   : > { %479 = vmatmul.mubr.f32.gmra.mrb[6].mxu0 %v339_v14  ;;  %1599 = vmatprep.subr.bf16.mxu1 %v1632_v8 }
  0x35   : > { %484 = vmatprep.mubr.f32.mxu0 %v1631_v7  ;;  %1544 = vmatpush1.bf16.msra.mxu0 %v1543_v61 }
  0x36   : > { %1545 = vmatprep.subr.bf16.mxu0 %v1632_v8 }
  0x37   : > { %1611 = vmatpush1.bf16.msra.mxu1 %v1564_v36 }
  0x38   : > { %485 = vmatmul.mubr.f32.gmra.mrb[8].mxu0 %v340_v18  ;;  %1600 = vmatprep.subr.bf16.mxu1 %v1632_v8 }
  0x39   : > { %490 = vmatprep.mubr.f32.mxu0 %v1631_v7  ;;  %1547 = vmatpush1.bf16.msra.mxu0 %v1546_v1 }
  0x3a   : > { %1548 = vmatprep.subr.bf16.mxu0 %v1632_v8 }
  0x3c   : > { %491 = vmatmul.mubr.f32.gmra.mrb[10].mxu0 %v341_v22 }
  0x3d   : > { %496 = vmatprep.mubr.f32.mxu0 %v1631_v7  ;;  %1550 = vmatpush1.bf16.msra.mxu0 %v1549_v5 }
  0x3e   : > { %1551 = vmatprep.subr.bf16.mxu0 %v1632_v8 }
  0x40   : > { %497 = vmatmul.mubr.f32.gmra.mrb[12].mxu0 %v342_v24 }
  0x41   : > { %502 = vmatprep.mubr.f32.mxu0 %v1631_v7  ;;  %1553 = vmatpush1.bf16.msra.mxu0 %v1552_v11 }
  0x42   : > { %1554 = vmatprep.subr.bf16.mxu0 %v1632_v8 }
  0x44   : > { %503 = vmatmul.mubr.f32.gmra.mrb[14].mxu0 %v343_v25 }
  0x45   : > { %508 = vmatprep.mubr.f32.mxu0 %v1631_v7  ;;  %1556 = vmatpush1.bf16.msra.mxu0 %v1555_v15 }
  0x46   : > { %1557 = vmatprep.subr.bf16.mxu0 %v1632_v8 }
  0x48   : > { %509 = vmatmul.mubr.f32.gmra.mrb[16].mxu0 %v344_v26 }
  0x49   : > { %514 = vmatprep.mubr.f32.mxu0 %v1631_v7  ;;  %1559 = vmatpush1.bf16.msra.mxu0 %v1558_v19 }
  0x4a   : > { %1560 = vmatprep.subr.bf16.mxu0 %v1632_v8 }
  0x4c   : > { %515 = vmatmul.mubr.f32.gmra.mrb[18].mxu0 %v345_v27 }
  0x4d   : > { %520 = vmatprep.mubr.f32.mxu0 %v1631_v7  ;;  %1562 = vmatpush1.bf16.msra.mxu0 %v1561_v23 }
  0x4e   : > { %1563 = vmatprep.subr.bf16.mxu0 %v1632_v8 }
  0x50   : > { %521 = vmatmul.mubr.f32.gmra.mrb[20].mxu0 %v346_v28 }
  0x51   : > { %526 = vmatprep.mubr.f32.mxu0 %v1631_v7  ;;  %1565 = vmatpush1.bf16.msra.mxu0 %v1564_v36 }
  0x52   : > { %1566 = vmatprep.subr.bf16.mxu0 %v1632_v8 }
  0x54   : > { %527 = vmatmul.mubr.f32.gmra.mrb[22].mxu0 %v347_v29 }
  0x55   : > { %532 = vmatprep.mubr.f32.mxu0 %v1631_v7 }
  0x58   : > { %533 = vmatmul.mubr.f32.gmra.mrb[24].mxu0 %v348_v30 }
  0x59   : > { %538 = vmatprep.mubr.f32.mxu0 %v1631_v7 }
  0x5c   : > { %539 = vmatmul.mubr.f32.gmra.mrb[26].mxu0 %v349_v31 }
  0x5d   : > { %544 = vmatprep.mubr.f32.mxu0 %v1631_v7 }
  0x60   : > { %545 = vmatmul.mubr.f32.gmra.mrb[28].mxu0 %v350_v32 }
  0x61   : > { %550 = vmatprep.mubr.f32.mxu0 %v1631_v7  ;;  %v612_v7 = vld [vmem:[%s2101_s3 + $0xb8] sm:$0xff] }
  0x62   : > { %v1567_v38 = vpack.c.bf16 %v612_v7, %v611_v37 }
  0x64   : > { %551 = vmatmul.mubr.f32.gmra.mrb[30].mxu0 %v351_v33  ;;  %1612 = vmatpush1.bf16.msra.mxu1 %v1567_v38 }
  0x65   : > { %1568 = vmatpush1.bf16.msra.mxu0 %v1567_v38 }
  0xfb   : > { %v462_v46 = vpop.f32.mrb[0].mxu0 }
  0xfc   : > { %v463_v47 = vadd.f32 %v462_v46, %v1931_v44  ;;  %v464_v48 = vpop.f32.mrb[1].mxu0 }
  0xfd   : > { %v465_v8 = vadd.f32 %v464_v48, %v1933_v45 }
  0xfe   : > { %v557_v51 = vmax.f32 %v463_v47, 0.0 }
  0xff   : > { %v558_v49 = vmax.f32 %v465_v8, 0.0  ;;  %v468_v50 = vpop.f32.mrb[2].mxu0 }
 0x100   : > { %v469_v52 = vadd.f32 %v468_v50, %v1931_v44  ;;  %v470_v53 = vpop.f32.mrb[3].mxu0 }
 0x101   : > { %v471_v54 = vadd.f32 %v470_v53, %v1933_v45  ;;  %1339 = vmatprep.mubr.msk.f32.mxu0 %vm620_vm0, %v558_v49 }
 0x102   : > { %734 = vmatmul.mubr.f32.vlgmr.msra.gmra.mrb[32].mxu0 %v557_v51  ;;  %v559_v57 = vmax.f32 %v469_v52, 0.0 }
 0x103   : > { %v560_v55 = vmax.f32 %v471_v54, 0.0  ;;  %v474_v56 = vpop.f32.mrb[4].mxu0 }
 0x104   : > { %v475_v58 = vadd.f32 %v474_v56, %v1931_v44  ;;  %v476_v59 = vpop.f32.mrb[5].mxu0 }
 0x105   : > { %v477_v60 = vadd.f32 %v476_v59, %v1933_v45  ;;  %1340 = vmatprep.mubr.msk.f32.mxu0 %vm620_vm0, %v560_v55 }
 0x106   : > { %739 = vmatmul.mubr.f32.gmra.mrb[34].mxu0 %v559_v57  ;;  %v561_v63 = vmax.f32 %v475_v58, 0.0 }
 0x107   : > { %v562_v61 = vmax.f32 %v477_v60, 0.0  ;;  %v480_v62 = vpop.f32.mrb[6].mxu0 }
 0x108   : > { %v481_v0 = vadd.f32 %v480_v62, %v1931_v44  ;;  %v482_v1 = vpop.f32.mrb[7].mxu0 }
 0x109   : > { %v483_v2 = vadd.f32 %v482_v1, %v1933_v45  ;;  %1341 = vmatprep.mubr.msk.f32.mxu1 %vm620_vm0, %v562_v61 }
 0x10a   : > { %744 = vmatmul.mubr.f32.vlgmr.msra.gmra.mrb[0].mxu1 %v561_v63  ;;  %v563_v5 = vmax.f32 %v481_v0, 0.0 }
 0x10b   : > { %v564_v3 = vmax.f32 %v483_v2, 0.0  ;;  %v486_v4 = vpop.f32.mrb[8].mxu0 }
 0x10c   : > { %v487_v6 = vadd.f32 %v486_v4, %v1931_v44  ;;  %v488_v9 = vpop.f32.mrb[9].mxu0 }
 0x10d   : > { %v489_v10 = vadd.f32 %v488_v9, %v1933_v45  ;;  %1342 = vmatprep.mubr.msk.f32.mxu1 %vm620_vm0, %v564_v3 }
 0x10e   : > { %749 = vmatmul.mubr.f32.gmra.mrb[2].mxu1 %v563_v5  ;;  %v565_v13 = vmax.f32 %v487_v6, 0.0 }
 0x10f   : > { %v566_v11 = vmax.f32 %v489_v10, 0.0  ;;  %v492_v12 = vpop.f32.mrb[10].mxu0 }
 0x110   : > { %v493_v14 = vadd.f32 %v492_v12, %v1931_v44  ;;  %v494_v15 = vpop.f32.mrb[11].mxu0 }
 0x111   : > { %v495_v16 = vadd.f32 %v494_v15, %v1933_v45  ;;  %1343 = vmatprep.mubr.msk.f32.mxu1 %vm620_vm0, %v566_v11 }
 0x112   : > { %754 = vmatmul.mubr.f32.gmra.mrb[4].mxu1 %v565_v13  ;;  %v567_v19 = vmax.f32 %v493_v14, 0.0 }
 0x113   : > { %v568_v17 = vmax.f32 %v495_v16, 0.0  ;;  %v498_v18 = vpop.f32.mrb[12].mxu0 }
 0x114   : > { %v499_v20 = vadd.f32 %v498_v18, %v1931_v44  ;;  %v500_v21 = vpop.f32.mrb[13].mxu0  ;;  %v831_v18 = vld [vmem:[%s2103_s5 + $0x8] sm:$0xff] }
 0x115   : > { %v501_v22 = vadd.f32 %v500_v21, %v1933_v45  ;;  %1344 = vmatprep.mubr.msk.f32.mxu1 %vm620_vm0, %v568_v17  ;;  %v830_v17 = vld [vmem:[%s2103_s5] sm:$0xff] }
 0x116   : > { %759 = vmatmul.mubr.f32.gmra.mrb[6].mxu1 %v567_v19  ;;  %v569_v25 = vmax.f32 %v499_v20, 0.0  ;;  %v1050_v19 = vld [vmem:[%s2105_s7 + $0x8] sm:$0xff]  ;;  %v1051_v20 = vld [vmem:[%s2105_s7 + $0x10] sm:$0xff] }
 0x117   : > { %v570_v23 = vmax.f32 %v501_v22, 0.0  ;;  %v504_v24 = vpop.f32.mrb[14].mxu0  ;;  %v1052_v22 = vld [vmem:[%s2105_s7 + $0x18] sm:$0xff] }
 0x118   : > { %v505_v26 = vadd.f32 %v504_v24, %v1931_v44  ;;  %v506_v27 = vpop.f32.mrb[15].mxu0  ;;  %v1053_v24 = vld [vmem:[%s2105_s7 + $0x20] sm:$0xff] }
 0x119   : > { %v507_v28 = vadd.f32 %v506_v27, %v1933_v45  ;;  %1345 = vmatprep.mubr.msk.f32.mxu1 %vm620_vm0, %v570_v23  ;;  %v1577_v23 = vpack.c.bf16 %v1052_v22, %v1051_v20  ;;  %v2010_v27 = vld [vmem:[%s2102_s4] ss:$0 sm:$0xff] }
 0x11a   : > { %764 = vmatmul.mubr.f32.gmra.mrb[8].mxu1 %v569_v25  ;;  %v571_v31 = vmax.f32 %v505_v26, 0.0  ;;  %v1054_v25 = vld [vmem:[%s2105_s7 + $0x28] sm:$0xff] }
 0x11b   : > { %v572_v29 = vmax.f32 %v507_v28, 0.0  ;;  %v510_v30 = vpop.f32.mrb[16].mxu0  ;;  %v1581_v26 = vpack.c.bf16 %v1054_v25, %v1053_v24 }
 0x11c   : > { %v511_v32 = vadd.f32 %v510_v30, %v1931_v44  ;;  %v512_v33 = vpop.f32.mrb[17].mxu0 }
 0x11d   : > { %v513_v34 = vadd.f32 %v512_v33, %v1933_v45  ;;  %1346 = vmatprep.mubr.msk.f32.mxu1 %vm620_vm0, %v572_v29 }
 0x11e   : > { %769 = vmatmul.mubr.f32.gmra.mrb[10].mxu1 %v571_v31  ;;  %v573_v37 = vmax.f32 %v511_v32, 0.0 }
 0x11f   : > { %v574_v35 = vmax.f32 %v513_v34, 0.0  ;;  %v516_v36 = vpop.f32.mrb[18].mxu0 }
 0x120   : > { %v517_v7 = vadd.f32 %v516_v36, %v1931_v44  ;;  %v518_v38 = vpop.f32.mrb[19].mxu0 }
 0x121   : > { %v519_v39 = vadd.f32 %v518_v38, %v1933_v45  ;;  %1347 = vmatprep.mubr.msk.f32.mxu1 %vm620_vm0, %v574_v35 }
 0x122   : > { %774 = vmatmul.mubr.f32.gmra.mrb[12].mxu1 %v573_v37  ;;  %v575_v42 = vmax.f32 %v517_v7, 0.0 }
 0x123   : > { %v576_v40 = vmax.f32 %v519_v39, 0.0  ;;  %v522_v41 = vpop.f32.mrb[20].mxu0 }
 0x124   : > { %v523_v43 = vadd.f32 %v522_v41, %v1931_v44  ;;  %v524_v46 = vpop.f32.mrb[21].mxu0 }
 0x125   : > { %v525_v47 = vadd.f32 %v524_v46, %v1933_v45  ;;  %1348 = vmatprep.mubr.msk.f32.mxu1 %vm620_vm0, %v576_v40 }
 0x126   : > { %779 = vmatmul.mubr.f32.gmra.mrb[14].mxu1 %v575_v42  ;;  %v577_v49 = vmax.f32 %v523_v43, 0.0 }
 0x127   : > { %v578_v48 = vmax.f32 %v525_v47, 0.0  ;;  %v528_v8 = vpop.f32.mrb[22].mxu0 }
 0x128   : > { %v529_v50 = vadd.f32 %v528_v8, %v1931_v44  ;;  %v530_v51 = vpop.f32.mrb[23].mxu0 }
 0x129   : > { %v531_v52 = vadd.f32 %v530_v51, %v1933_v45  ;;  %1349 = vmatprep.mubr.msk.f32.mxu1 %vm620_vm0, %v578_v48 }
 0x12a   : > { %784 = vmatmul.mubr.f32.gmra.mrb[16].mxu1 %v577_v49  ;;  %v579_v55 = vmax.f32 %v529_v50, 0.0 }
 0x12b   : > { %v580_v53 = vmax.f32 %v531_v52, 0.0  ;;  %v534_v54 = vpop.f32.mrb[24].mxu0 }
 0x12c   : > { %v535_v56 = vadd.f32 %v534_v54, %v1931_v44  ;;  %v536_v57 = vpop.f32.mrb[25].mxu0 }
 0x12d   : > { %v537_v58 = vadd.f32 %v536_v57, %v1933_v45  ;;  %1350 = vmatprep.mubr.msk.f32.mxu1 %vm620_vm0, %v580_v53 }
 0x12e   : > { %789 = vmatmul.mubr.f32.gmra.mrb[18].mxu1 %v579_v55  ;;  %v581_v61 = vmax.f32 %v535_v56, 0.0 }
 0x12f   : > { %v582_v59 = vmax.f32 %v537_v58, 0.0  ;;  %v540_v60 = vpop.f32.mrb[26].mxu0 }
 0x130   : > { %v541_v62 = vadd.f32 %v540_v60, %v1931_v44  ;;  %v542_v63 = vpop.f32.mrb[27].mxu0 }
 0x131   : > { %v543_v0 = vadd.f32 %v542_v63, %v1933_v45  ;;  %1351 = vmatprep.mubr.msk.f32.mxu1 %vm620_vm0, %v582_v59 }
 0x132   : > { %794 = vmatmul.mubr.f32.gmra.mrb[20].mxu1 %v581_v61  ;;  %v583_v3 = vmax.f32 %v541_v62, 0.0 }
 0x133   : > { %v584_v1 = vmax.f32 %v543_v0, 0.0  ;;  %v546_v2 = vpop.f32.mrb[28].mxu0 }
 0x134   : > { %v547_v4 = vadd.f32 %v546_v2, %v1931_v44  ;;  %v548_v5 = vpop.f32.mrb[29].mxu0 }
 0x135   : > { %v549_v6 = vadd.f32 %v548_v5, %v1933_v45  ;;  %1352 = vmatprep.mubr.msk.f32.mxu1 %vm620_vm0, %v584_v1 }
 0x136   : > { %799 = vmatmul.mubr.f32.gmra.mrb[22].mxu1 %v583_v3  ;;  %v585_v11 = vmax.f32 %v547_v4, 0.0 }
 0x137   : > { %v586_v9 = vmax.f32 %v549_v6, 0.0  ;;  %v552_v10 = vpop.f32.mrb[30].mxu0 }
 0x138   : > { %v553_v12 = vadd.f32 %v552_v10, %v1931_v44  ;;  %v554_v13 = vpop.f32.mrb[31].mxu0  ;;  %v1569_v44 = vpack.c.bf16 %v831_v18, %v830_v17 }
 0x139   : > { %v555_v14 = vadd.f32 %v554_v13, %v1933_v45  ;;  %1353 = vmatprep.mubr.msk.f32.mxu1 %vm620_vm0, %v586_v9  ;;  %v1049_v45 = vld [vmem:[%s2105_s7] sm:$0xff] }
 0x13a   : > { %804 = vmatmul.mubr.f32.gmra.mrb[24].mxu1 %v585_v11  ;;  %v587_v16 = vmax.f32 %v553_v12, 0.0  ;;  %1570 = vmatprep.subr.bf16.mxu0 %v1569_v44  ;;  %v1573_v21 = vpack.c.bf16 %v1050_v19, %v1049_v45 }
 0x13b   : > { %v588_v15 = vmax.f32 %v555_v14, 0.0  ;;  %1572 = vmatpush3.bf16.msra.mxu0 %v1569_v44 }
 0x13c   : > { %1574 = vmatprep.subr.bf16.mxu1 %v1573_v21 }
 0x13d   : > { %1354 = vmatprep.mubr.msk.f32.mxu1 %vm620_vm0, %v588_v15  ;;  %1576 = vmatpush3.bf16.msra.mxu1 %v1573_v21 }
 0x13e   : > { %809 = vmatmul.mubr.f32.gmra.mrb[26].mxu1 %v587_v16  ;;  %1578 = vmatprep.subr.bf16.mxu1 %v1577_v23 }
 0x141   : > { %1580 = vmatpush3.bf16.msra.mxu1 %v1577_v23 }
 0x142   : > { %1582 = vmatprep.subr.bf16.mxu1 %v1581_v26 }
 0x145   : > { %1584 = vmatpush3.bf16.msra.mxu1 %v1581_v26 }
 0x1d5   : > { %v735_v28 = vpop.f32.mrb[32].mxu0 }
 0x1d6   : > { %v736_v29 = vadd.f32 %v2010_v27, %v735_v28  ;;  %v737_v30 = vpop.f32.mrb[33].mxu0 }
 0x1d7   : > { %v1056_v30 = vld [vmem:[%s2105_s7 + $0x38] sm:$0xff] }
 0x1d8   : > { %v814_v31 = vmax.f32 %v736_v29, 0.0  ;;  %v1055_v29 = vld [vmem:[%s2105_s7 + $0x30] sm:$0xff] }
 0x1d9   : > { %v740_v32 = vpop.f32.mrb[34].mxu0 }
 0x1da   : > { %v741_v33 = vadd.f32 %v2010_v27, %v740_v32  ;;  %v742_v34 = vpop.f32.mrb[35].mxu0  ;;  %1437 = vmatprep.mubr.msk.f32.mxu0 %vm839_vm1, %v814_v31  ;;  %v1585_v31 = vpack.c.bf16 %v1056_v30, %v1055_v29 }
 0x1dc   : > { %v815_v35 = vmax.f32 %v741_v33, 0.0  ;;  %1586 = vmatprep.subr.bf16.mxu1 %v1585_v31 }
 0x1dd   : > { %v745_v36 = vpop.f32.mrb[0].mxu1  ;;  %1588 = vmatpush3.bf16.msra.mxu1 %v1585_v31 }
 0x1de   : > { %v746_v37 = vadd.f32 %v2010_v27, %v745_v36  ;;  %v747_v7 = vpop.f32.mrb[1].mxu1  ;;  %1438 = vmatmul.mubr.msk.f32.vlgmr.msra.gmra.mrb[36].mxu0 %vm839_vm1, %v815_v35 }
 0x1e0   : > { %v816_v38 = vmax.f32 %v746_v37, 0.0 }
 0x1e1   : > { %v750_v39 = vpop.f32.mrb[2].mxu1 }
 0x1e2   : > { %v751_v40 = vadd.f32 %v2010_v27, %v750_v39  ;;  %v752_v41 = vpop.f32.mrb[3].mxu1  ;;  %1440 = vmatprep.mubr.msk.f32.mxu0 %vm839_vm1, %v816_v38 }
 0x1e4   : > { %v817_v42 = vmax.f32 %v751_v40, 0.0 }
 0x1e5   : > { %v755_v43 = vpop.f32.mrb[4].mxu1 }
 0x1e6   : > { %v756_v46 = vadd.f32 %v2010_v27, %v755_v43  ;;  %v757_v47 = vpop.f32.mrb[5].mxu1  ;;  %1441 = vmatmul.mubr.msk.f32.gmra.mrb[38].mxu0 %vm839_vm1, %v817_v42 }
 0x1e8   : > { %v818_v48 = vmax.f32 %v756_v46, 0.0 }
 0x1e9   : > { %v760_v8 = vpop.f32.mrb[6].mxu1 }
 0x1ea   : > { %v761_v49 = vadd.f32 %v2010_v27, %v760_v8  ;;  %v762_v50 = vpop.f32.mrb[7].mxu1  ;;  %1443 = vmatprep.mubr.msk.f32.mxu0 %vm839_vm1, %v818_v48 }
 0x1ec   : > { %v819_v51 = vmax.f32 %v761_v49, 0.0 }
 0x1ed   : > { %v765_v52 = vpop.f32.mrb[8].mxu1 }
 0x1ee   : > { %v766_v53 = vadd.f32 %v2010_v27, %v765_v52  ;;  %v767_v54 = vpop.f32.mrb[9].mxu1  ;;  %1444 = vmatmul.mubr.msk.f32.gmra.mrb[40].mxu0 %vm839_vm1, %v819_v51 }
 0x1f0   : > { %v820_v55 = vmax.f32 %v766_v53, 0.0 }
 0x1f1   : > { %v770_v56 = vpop.f32.mrb[10].mxu1 }
 0x1f2   : > { %v771_v57 = vadd.f32 %v2010_v27, %v770_v56  ;;  %v772_v58 = vpop.f32.mrb[11].mxu1  ;;  %1446 = vmatprep.mubr.msk.f32.mxu0 %vm839_vm1, %v820_v55 }
 0x1f4   : > { %v821_v59 = vmax.f32 %v771_v57, 0.0 }
 0x1f5   : > { %v775_v60 = vpop.f32.mrb[12].mxu1 }
 0x1f6   : > { %v776_v61 = vadd.f32 %v2010_v27, %v775_v60  ;;  %v777_v62 = vpop.f32.mrb[13].mxu1  ;;  %1447 = vmatmul.mubr.msk.f32.gmra.mrb[42].mxu0 %vm839_vm1, %v821_v59 }
 0x1f8   : > { %v822_v63 = vmax.f32 %v776_v61, 0.0 }
 0x1f9   : > { %v780_v0 = vpop.f32.mrb[14].mxu1 }
 0x1fa   : > { %v781_v1 = vadd.f32 %v2010_v27, %v780_v0  ;;  %v782_v2 = vpop.f32.mrb[15].mxu1  ;;  %1449 = vmatprep.mubr.msk.f32.mxu0 %vm839_vm1, %v822_v63 }
 0x1fc   : > { %v823_v3 = vmax.f32 %v781_v1, 0.0 }
 0x1fd   : > { %v785_v4 = vpop.f32.mrb[16].mxu1 }
 0x1fe   : > { %v786_v5 = vadd.f32 %v2010_v27, %v785_v4  ;;  %v787_v6 = vpop.f32.mrb[17].mxu1  ;;  %1450 = vmatmul.mubr.msk.f32.gmra.mrb[44].mxu0 %vm839_vm1, %v823_v3 }
 0x200   : > { %v824_v9 = vmax.f32 %v786_v5, 0.0 }
 0x201   : > { %v790_v10 = vpop.f32.mrb[18].mxu1 }
 0x202   : > { %v791_v11 = vadd.f32 %v2010_v27, %v790_v10  ;;  %v792_v12 = vpop.f32.mrb[19].mxu1  ;;  %1452 = vmatprep.mubr.msk.f32.mxu0 %vm839_vm1, %v824_v9 }
 0x204   : > { %v825_v13 = vmax.f32 %v791_v11, 0.0 }
 0x205   : > { %v795_v14 = vpop.f32.mrb[20].mxu1 }
 0x206   : > { %v796_v15 = vadd.f32 %v2010_v27, %v795_v14  ;;  %v797_v16 = vpop.f32.mrb[21].mxu1  ;;  %1453 = vmatmul.mubr.msk.f32.gmra.mrb[46].mxu0 %vm839_vm1, %v825_v13 }
 0x208   : > { %v826_v17 = vmax.f32 %v796_v15, 0.0 }
 0x209   : > { %v800_v18 = vpop.f32.mrb[22].mxu1 }
 0x20a   : > { %v801_v44 = vadd.f32 %v2010_v27, %v800_v18  ;;  %v802_v45 = vpop.f32.mrb[23].mxu1  ;;  %1455 = vmatprep.mubr.msk.f32.mxu0 %vm839_vm1, %v826_v17  ;;  %v1372_v18 = vld [vmem:[%s2106_s8] ss:$0 sm:$0xff] }
 0x20c   : > { %v827_v19 = vmax.f32 %v801_v44, 0.0 }
 0x20d   : > { %v805_v20 = vpop.f32.mrb[24].mxu1 }
 0x20e   : > { %v806_v21 = vadd.f32 %v2010_v27, %v805_v20  ;;  %v807_v22 = vpop.f32.mrb[25].mxu1  ;;  %1456 = vmatmul.mubr.msk.f32.gmra.mrb[48].mxu0 %vm839_vm1, %v827_v19 }
 0x210   : > { %v828_v23 = vmax.f32 %v806_v21, 0.0 }
 0x211   : > { %v810_v24 = vpop.f32.mrb[26].mxu1 }
 0x212   : > { %v811_v25 = vadd.f32 %v2010_v27, %v810_v24  ;;  %v812_v26 = vpop.f32.mrb[27].mxu1  ;;  %1458 = vmatprep.mubr.msk.f32.mxu0 %vm839_vm1, %v828_v23  ;;  %v1355_v27 = vld [vmem:[%s2104_s6] ss:$0 sm:$0xff] }
 0x214   : > { %v829_v28 = vmax.f32 %v811_v25, 0.0 }
 0x216   : > { %1459 = vmatmul.mubr.msk.f32.gmra.mrb[50].mxu0 %vm839_vm1, %v829_v28 }
 0x2b1   : > { %v1439_v32 = vpop.f32.mrb[36].mxu0 }
 0x2b2   : > { %v960_v33 = vadd.f32 %v1439_v32, %v1355_v27  ;;  %v954_v34 = vpop.f32.mrb[37].mxu0 }
 0x2b3   : > { %v955_v35 = vadd.f32 %v1355_v27, %v954_v34 }
 0x2b4   : > { %v1034_v37 = vmax.f32 %v960_v33, 0.0 }
 0x2b5   : > { %v1033_v36 = vmax.f32 %v955_v35, 0.0 }
 0x2b7   : > { %1477 = vmatprep.mubr.msk.f32.mxu1 %vm620_vm0, %v1033_v36 }
 0x2b8   : > { %1478 = vmatmul.mubr.msk.f32.vlgmr.msra.gmra.mrb[28].mxu1 %vm620_vm0, %v1034_v37 }
 0x2b9   : > { %v1442_v7 = vpop.f32.mrb[38].mxu0 }
 0x2ba   : > { %v970_v38 = vadd.f32 %v1442_v7, %v1355_v27  ;;  %v964_v39 = vpop.f32.mrb[39].mxu0 }
 0x2bb   : > { %v965_v40 = vadd.f32 %v1355_v27, %v964_v39 }
 0x2bc   : > { %v1036_v42 = vmax.f32 %v970_v38, 0.0 }
 0x2bd   : > { %v1035_v41 = vmax.f32 %v965_v40, 0.0 }
 0x2bf   : > { %1480 = vmatprep.mubr.msk.f32.mxu1 %vm620_vm0, %v1035_v41 }
 0x2c0   : > { %1481 = vmatmul.mubr.msk.f32.gmra.mrb[30].mxu1 %vm620_vm0, %v1036_v42 }
 0x2c1   : > { %v1445_v43 = vpop.f32.mrb[40].mxu0 }
 0x2c2   : > { %v980_v46 = vadd.f32 %v1445_v43, %v1355_v27  ;;  %v974_v47 = vpop.f32.mrb[41].mxu0 }
 0x2c3   : > { %v975_v48 = vadd.f32 %v1355_v27, %v974_v47 }
 0x2c4   : > { %v1038_v49 = vmax.f32 %v980_v46, 0.0 }
 0x2c5   : > { %v1037_v8 = vmax.f32 %v975_v48, 0.0 }
 0x2c7   : > { %1483 = vmatprep.mubr.msk.f32.mxu1 %vm620_vm0, %v1037_v8 }
 0x2c8   : > { %1484 = vmatmul.mubr.msk.f32.gmra.mrb[32].mxu1 %vm620_vm0, %v1038_v49 }
 0x2c9   : > { %v1448_v50 = vpop.f32.mrb[42].mxu0 }
 0x2ca   : > { %v990_v51 = vadd.f32 %v1448_v50, %v1355_v27  ;;  %v984_v52 = vpop.f32.mrb[43].mxu0 }
 0x2cb   : > { %v985_v53 = vadd.f32 %v1355_v27, %v984_v52 }
 0x2cc   : > { %v1040_v55 = vmax.f32 %v990_v51, 0.0 }
 0x2cd   : > { %v1039_v54 = vmax.f32 %v985_v53, 0.0 }
 0x2cf   : > { %1486 = vmatprep.mubr.msk.f32.mxu1 %vm620_vm0, %v1039_v54 }
 0x2d0   : > { %1487 = vmatmul.mubr.msk.f32.gmra.mrb[34].mxu1 %vm620_vm0, %v1040_v55 }
 0x2d1   : > { %v1451_v56 = vpop.f32.mrb[44].mxu0 }
 0x2d2   : > { %v1000_v57 = vadd.f32 %v1451_v56, %v1355_v27  ;;  %v994_v58 = vpop.f32.mrb[45].mxu0 }
 0x2d3   : > { %v995_v59 = vadd.f32 %v1355_v27, %v994_v58 }
 0x2d4   : > { %v1042_v61 = vmax.f32 %v1000_v57, 0.0 }
 0x2d5   : > { %v1041_v60 = vmax.f32 %v995_v59, 0.0 }
 0x2d7   : > { %1489 = vmatprep.mubr.msk.f32.mxu1 %vm620_vm0, %v1041_v60 }
 0x2d8   : > { %1490 = vmatmul.mubr.msk.f32.gmra.mrb[36].mxu1 %vm620_vm0, %v1042_v61 }
 0x2d9   : > { %v1454_v62 = vpop.f32.mrb[46].mxu0 }
 0x2da   : > { %v1010_v63 = vadd.f32 %v1454_v62, %v1355_v27  ;;  %v1004_v0 = vpop.f32.mrb[47].mxu0 }
 0x2db   : > { %v1005_v1 = vadd.f32 %v1355_v27, %v1004_v0 }
 0x2dc   : > { %v1044_v3 = vmax.f32 %v1010_v63, 0.0 }
 0x2dd   : > { %v1043_v2 = vmax.f32 %v1005_v1, 0.0 }
 0x2df   : > { %1492 = vmatprep.mubr.msk.f32.mxu1 %vm620_vm0, %v1043_v2 }
 0x2e0   : > { %1493 = vmatmul.mubr.msk.f32.gmra.mrb[38].mxu1 %vm620_vm0, %v1044_v3 }
 0x2e1   : > { %v1457_v4 = vpop.f32.mrb[48].mxu0 }
 0x2e2   : > { %v1020_v5 = vadd.f32 %v1457_v4, %v1355_v27  ;;  %v1014_v6 = vpop.f32.mrb[49].mxu0 }
 0x2e3   : > { %v1015_v9 = vadd.f32 %v1355_v27, %v1014_v6 }
 0x2e4   : > { %v1046_v11 = vmax.f32 %v1020_v5, 0.0 }
 0x2e5   : > { %v1045_v10 = vmax.f32 %v1015_v9, 0.0 }
 0x2e7   : > { %1495 = vmatprep.mubr.msk.f32.mxu1 %vm620_vm0, %v1045_v10 }
 0x2e8   : > { %1496 = vmatmul.mubr.msk.f32.gmra.mrb[40].mxu1 %vm620_vm0, %v1046_v11 }
 0x2e9   : > { %v1460_v12 = vpop.f32.mrb[50].mxu0 }
 0x2ea   : > { %v1030_v13 = vadd.f32 %v1460_v12, %v1355_v27  ;;  %v1024_v14 = vpop.f32.mrb[51].mxu0 }
 0x2eb   : > { %v1025_v15 = vadd.f32 %v1355_v27, %v1024_v14 }
 0x2ec   : > { %v1048_v17 = vmax.f32 %v1030_v13, 0.0 }
 0x2ed   : > { %v1047_v16 = vmax.f32 %v1025_v15, 0.0 }
 0x2ef   : > { %1498 = vmatprep.mubr.msk.f32.mxu1 %vm620_vm0, %v1047_v16 }
 0x2f0   : > { %1499 = vmatmul.mubr.msk.f32.gmra.mrb[42].mxu1 %vm620_vm0, %v1048_v17 }
 0x38b   : > { %v1479_v44 = vpop.f32.mrb[28].mxu1 }
 0x38c   : > { %v1184_v45 = vadd.f32 %v1479_v44, %v1372_v18  ;;  %v1178_v19 = vpop.f32.mrb[29].mxu1 }
 0x38d   : > { %v1179_v20 = vadd.f32 %v1372_v18, %v1178_v19 }
 0x38e   : > { %1258 = vst [vmem:[%s2077_s28 + $0x8] sm:$0xff] %v1184_v45 }
 0x38f   : > { %1257 = vst [vmem:[%s2077_s28] sm:$0xff] %v1179_v20 }
 0x393   : > { %v1482_v21 = vpop.f32.mrb[30].mxu1 }
 0x394   : > { %v1194_v22 = vadd.f32 %v1482_v21, %v1372_v18  ;;  %v1188_v23 = vpop.f32.mrb[31].mxu1 }
 0x395   : > { %v1189_v24 = vadd.f32 %v1372_v18, %v1188_v23 }
 0x396   : > { %1260 = vst [vmem:[%s2077_s28 + $0x18] sm:$0xff] %v1194_v22 }
 0x397   : > { %1259 = vst [vmem:[%s2077_s28 + $0x10] sm:$0xff] %v1189_v24 }
 0x39b   : > { %v1485_v25 = vpop.f32.mrb[32].mxu1 }
 0x39c   : > { %v1204_v26 = vadd.f32 %v1485_v25, %v1372_v18  ;;  %v1198_v28 = vpop.f32.mrb[33].mxu1 }
 0x39d   : > { %v1199_v29 = vadd.f32 %v1372_v18, %v1198_v28 }
 0x39e   : > { %1262 = vst [vmem:[%s2077_s28 + $0x28] sm:$0xff] %v1204_v26 }
 0x39f   : > { %1261 = vst [vmem:[%s2077_s28 + $0x20] sm:$0xff] %v1199_v29 }
 0x3a3   : > { %v1488_v30 = vpop.f32.mrb[34].mxu1 }
 0x3a4   : > { %v1214_v31 = vadd.f32 %v1488_v30, %v1372_v18  ;;  %v1208_v27 = vpop.f32.mrb[35].mxu1 }
 0x3a5   : > { %v1209_v32 = vadd.f32 %v1372_v18, %v1208_v27 }
 0x3a6   : > { %1264 = vst [vmem:[%s2077_s28 + $0x38] sm:$0xff] %v1214_v31 }
 0x3a7   : > { %1263 = vst [vmem:[%s2077_s28 + $0x30] sm:$0xff] %v1209_v32 }
 0x3ab   : > { %v1491_v33 = vpop.f32.mrb[36].mxu1 }
 0x3ac   : > { %v1224_v34 = vadd.f32 %v1491_v33, %v1372_v18  ;;  %v1218_v35 = vpop.f32.mrb[37].mxu1 }
 0x3ad   : > { %v1219_v36 = vadd.f32 %v1372_v18, %v1218_v35 }
 0x3ae   : > { %1266 = vst [vmem:[%s2077_s28 + $0x48] sm:$0xff] %v1224_v34 }
 0x3af   : > { %1265 = vst [vmem:[%s2077_s28 + $0x40] sm:$0xff] %v1219_v36 }
 0x3b3   : > { %v1494_v37 = vpop.f32.mrb[38].mxu1 }
 0x3b4   : > { %v1234_v7 = vadd.f32 %v1494_v37, %v1372_v18  ;;  %v1228_v38 = vpop.f32.mrb[39].mxu1 }
 0x3b5   : > { %v1229_v39 = vadd.f32 %v1372_v18, %v1228_v38 }
 0x3b6   : > { %1268 = vst [vmem:[%s2077_s28 + $0x58] sm:$0xff] %v1234_v7 }
 0x3b7   : > { %1267 = vst [vmem:[%s2077_s28 + $0x50] sm:$0xff] %v1229_v39 }
 0x3bb   : > { %v1497_v40 = vpop.f32.mrb[40].mxu1 }
 0x3bc   : > { %v1244_v41 = vadd.f32 %v1497_v40, %v1372_v18  ;;  %v1238_v42 = vpop.f32.mrb[41].mxu1 }
 0x3bd   : > { %v1239_v43 = vadd.f32 %v1372_v18, %v1238_v42 }
 0x3be   : > { %1270 = vst [vmem:[%s2077_s28 + $0x68] sm:$0xff] %v1244_v41 }
 0x3bf   : > { %1269 = vst [vmem:[%s2077_s28 + $0x60] sm:$0xff] %v1239_v43 }
 0x3c3   : > { %v1500_v46 = vpop.f32.mrb[42].mxu1 }
 0x3c4   : > { %v1254_v47 = vadd.f32 %v1500_v46, %v1372_v18  ;;  %v1248_v48 = vpop.f32.mrb[43].mxu1 }
 0x3c5   : > { %v1249_v8 = vadd.f32 %v1372_v18, %v1248_v48 }
 0x3c6   : > { %1272 = vst [vmem:[%s2077_s28 + $0x78] sm:$0xff] %v1254_v47 }
 0x3c7   : > { %1271 = vst [vmem:[%s2077_s28 + $0x70] sm:$0xff] %v1249_v8 }
 0x3c8 PF: > { %s19_s30 = sadd.s32 1, %s1629_s30  }
 0x3c9   : > { %p16_p4 = scmp.ge.s32.totalorder %s19_s30, 5  }
 0x3cb   :  { %18 = sbr.rel (!%p16_p4) target bundleno = 1 (0x1), region = 86 }

</bundles_post_ra>
